<compile_context>
chip_gen: v5e
topology: v5e:2x2
jax: 0.10.0
libtpu: 0.0.40
codegen_flags: <defaults>
</compile_context>

<pallas_src>
import jax
import jax.numpy as jnp
import numpy as np
from jax.experimental import pallas as pl
from jax.experimental.pallas import tpu as pltpu


def _softmax_lane_row(s, out_ref):
    """Numerically-stable softmax over the lane axis of a (1, N) row."""
    m = jnp.max(s, axis=1, keepdims=True)            # cross-lane reduce (XLU)
    e = jnp.exp(s - m)                               # EUP
    denom = jnp.sum(e, axis=1, keepdims=True)        # cross-lane reduce (XLU)
    r = pl.reciprocal(denom, approx=True)            # EUP slot (otherwise idle)
    r = r * (2.0 - denom * r)                        # one Newton step -> ~exact
    out_ref[...] = e * r


def pointer_kernel_masked(leaf_t_ref, w_ref, bias_ref, mask_ref, out_ref):
    # (D, N) * (D, 1) -> reduce over D (sublanes) -> (1, N) scores on the lanes.
    s = jnp.sum(leaf_t_ref[...] * w_ref[...], axis=0, keepdims=True) + bias_ref[0, 0]
    # Additive mask: 0 for keep, -inf for masked-out (matches masked_fill + softmax).
    _softmax_lane_row(s + mask_ref[...], out_ref)


def pointer_kernel_nomask(leaf_t_ref, w_ref, bias_ref, out_ref):
    s = jnp.sum(leaf_t_ref[...] * w_ref[...], axis=0, keepdims=True) + bias_ref[0, 0]
    _softmax_lane_row(s, out_ref)


def pointer_forward(leaf_node, curr_item, w_weight, w_bias, v_weight, v_bias,
                    mask=None):
    """JAX wrapper mirroring Pointer.forward.

    leaf_node: (N, D) float ; curr_item: anything flattening to (D,)
    w_weight : (H, 2D) (PyTorch nn.Linear layout) ; w_bias: (H,)
    v_weight : (1, H)                              ; v_bias: (1,)
    mask     : optional (N,) ints/bools; 0 == masked out.
    Returns (N,) softmax probabilities.

    NOTE: like the PyTorch original, an all-masked input yields NaNs.
    """
    leaf = leaf_node.astype(jnp.float32)
    N, D = leaf.shape
    curr = jnp.reshape(curr_item, (-1,)).astype(jnp.float32)             # (D,)

    # Fold v into W (done per call here; in deployment precompute once):
    #   w_eff = v @ W : (1, 2D)   -> leaf part (D,) + scalar curr/bias part.
    w_eff = jnp.dot(v_weight.astype(jnp.float32),
                    w_weight.astype(jnp.float32))                        # (1, 2D)
    w_col = jnp.reshape(w_eff[0, :D], (D, 1))                            # (D, 1)
    scalar_bias = (jnp.dot(v_weight[0].astype(jnp.float32),
                           w_bias.astype(jnp.float32))
                   + v_bias.astype(jnp.float32)[0]
                   + jnp.dot(w_eff[0, D:], curr))                        # scalar
    bias_arr = jnp.reshape(scalar_bias, (1, 1)).astype(jnp.float32)      # SMEM

    # Lane-dense layout: put N (leaf nodes) on the 128-lane axis.
    leaf_t = jnp.transpose(leaf)                                         # (D, N)

    vmem = pl.BlockSpec(memory_space=pltpu.MemorySpace.VMEM)
    smem = pl.BlockSpec(memory_space=pltpu.MemorySpace.SMEM)

    if mask is None:
        prob_row = pl.pallas_call(
            pointer_kernel_nomask,
            out_shape=jax.ShapeDtypeStruct((1, N), jnp.float32),
            in_specs=[vmem, vmem, smem],
            out_specs=vmem,
        )(leaf_t, w_col, bias_arr)
    else:
        add_mask = jnp.where(jnp.reshape(mask, (1, N)) == 0,
                             -jnp.inf, 0.0).astype(jnp.float32)          # (1, N)
        prob_row = pl.pallas_call(
            pointer_kernel_masked,
            out_shape=jax.ShapeDtypeStruct((1, N), jnp.float32),
            in_specs=[vmem, vmem, smem, vmem],
            out_specs=vmem,
        )(leaf_t, w_col, bias_arr, add_mask)

    return prob_row[0]                                                   # (N,)


def pointer_reference(leaf_node, curr_item, w_weight, w_bias, v_weight, v_bias,
                      mask=None):
    """Pure-JAX reference of the PyTorch forward (unfused), for verification."""
    N, D = leaf_node.shape
    curr = jnp.broadcast_to(jnp.reshape(curr_item, (1, -1)), (N, D))
    x = jnp.concatenate([leaf_node, curr], axis=1)
    h = x @ w_weight.T + w_bias
    s = (h @ v_weight.T + v_bias)[:, 0]
    if mask is not None:
        s = jnp.where(mask == 0, -jnp.inf, s)
    return jax.nn.softmax(s, axis=-1)


if __name__ == "__main__":
    # Small shapes consistent with the module: N leaf nodes, input_dim D, hidden H.
    N, D, H = 8, 16, 32

    key = jax.random.PRNGKey(0)
    k_leaf, k_curr, k_w, k_bw, k_v, k_bv = jax.random.split(key, 6)

    leaf_node = jax.random.normal(k_leaf, (N, D), dtype=jnp.float32)
    curr_item = jax.random.normal(k_curr, (D,), dtype=jnp.float32)

    # Deterministic synthetic parameters (nn.Linear shapes).
    w_weight = 0.1 * jax.random.normal(k_w, (H, 2 * D), dtype=jnp.float32)  # W.weight
    w_bias = 0.1 * jax.random.normal(k_bw, (H,), dtype=jnp.float32)         # W.bias
    v_weight = 0.1 * jax.random.normal(k_v, (1, H), dtype=jnp.float32)      # v.weight
    v_bias = 0.1 * jax.random.normal(k_bv, (1,), dtype=jnp.float32)         # v.bias

    # Mask with a couple of disallowed positions (0 == masked).
    mask = jnp.array([1, 1, 0, 1, 1, 0, 1, 1], dtype=jnp.int32)

    prob = pointer_forward(leaf_node, curr_item, w_weight, w_bias,
                           v_weight, v_bias, mask)
    prob = jax.block_until_ready(prob)

    ref = pointer_reference(leaf_node, curr_item, w_weight, w_bias,
                            v_weight, v_bias, mask)
    np.testing.assert_allclose(np.asarray(prob), np.asarray(ref),
                               rtol=5e-4, atol=1e-6)

    # Also exercise the mask=None path (separate, mask-free kernel).
    prob_nomask = jax.block_until_ready(
        pointer_forward(leaf_node, curr_item, w_weight, w_bias, v_weight, v_bias))
    ref_nomask = pointer_reference(leaf_node, curr_item, w_weight, w_bias,
                                   v_weight, v_bias)
    np.testing.assert_allclose(np.asarray(prob_nomask), np.asarray(ref_nomask),
                               rtol=5e-4, atol=1e-6)

    print("KERNEL_OK")
</pallas_src>

<mosaic_0001>
module attributes {stable_mosaic.version = 11 : i64} {
  func.func @pointer_kernel_masked(%arg0: memref<16x8xf32, #tpu.memory_space<vmem>>, %arg1: memref<16x1xf32, #tpu.memory_space<vmem>>, %arg2: memref<1x1xf32, #tpu.memory_space<smem>>, %arg3: memref<1x8xf32, #tpu.memory_space<vmem>>, %arg4: memref<1x8xf32, #tpu.memory_space<vmem>>) attributes {dimension_semantics = [], scalar_prefetch = 0 : i64, scratch_operands = 0 : i64, tpu.core_type = #tpu.core_type<tc>} {
    %c0 = arith.constant 0 : index
    %c0_0 = arith.constant 0 : index
    %0 = vector.load %arg0[%c0, %c0_0] : memref<16x8xf32, #tpu.memory_space<vmem>>, vector<16x8xf32>
    %c0_1 = arith.constant 0 : index
    %c0_2 = arith.constant 0 : index
    %1 = vector.load %arg1[%c0_1, %c0_2] : memref<16x1xf32, #tpu.memory_space<vmem>>, vector<16x1xf32>
    %2 = vector.broadcast %1 : vector<16x1xf32> to vector<16x8xf32>
    %3 = arith.mulf %0, %2 : vector<16x8xf32>
    %cst = arith.constant dense<0.000000e+00> : vector<8xf32>
    %4 = vector.multi_reduction <add>, %3, %cst [0] : vector<16x8xf32> to vector<8xf32>
    %5 = vector.shape_cast %4 : vector<8xf32> to vector<1x8xf32>
    %c0_3 = arith.constant 0 : index
    %c0_4 = arith.constant 0 : index
    %6 = memref.load %arg2[%c0_3, %c0_4] : memref<1x1xf32, #tpu.memory_space<smem>>
    %7 = vector.broadcast %6 : f32 to vector<1x8xf32>
    %8 = arith.addf %5, %7 : vector<1x8xf32>
    %c0_5 = arith.constant 0 : index
    %c0_6 = arith.constant 0 : index
    %9 = vector.load %arg3[%c0_5, %c0_6] : memref<1x8xf32, #tpu.memory_space<vmem>>, vector<1x8xf32>
    %10 = arith.addf %8, %9 : vector<1x8xf32>
    %cst_7 = arith.constant dense<0xFF800000> : vector<1xf32>
    %11 = vector.multi_reduction <maximumf>, %10, %cst_7 [1] : vector<1x8xf32> to vector<1xf32>
    %12 = vector.shape_cast %11 : vector<1xf32> to vector<1x1xf32>
    %13 = vector.broadcast %12 : vector<1x1xf32> to vector<1x8xf32>
    %14 = arith.subf %10, %13 : vector<1x8xf32>
    %15 = math.exp %14 : vector<1x8xf32>
    %cst_8 = arith.constant dense<0.000000e+00> : vector<1xf32>
    %16 = vector.multi_reduction <add>, %15, %cst_8 [1] : vector<1x8xf32> to vector<1xf32>
    %17 = vector.shape_cast %16 : vector<1xf32> to vector<1x1xf32>
    %18 = tpu.reciprocal %17 {approx = true} : vector<1x1xf32> -> vector<1x1xf32>
    %19 = arith.mulf %17, %18 : vector<1x1xf32>
    %cst_9 = arith.constant 2.000000e+00 : f32
    %20 = vector.broadcast %cst_9 : f32 to vector<1x1xf32>
    %21 = arith.subf %20, %19 : vector<1x1xf32>
    %22 = arith.mulf %18, %21 : vector<1x1xf32>
    %23 = vector.broadcast %22 : vector<1x1xf32> to vector<1x8xf32>
    %24 = arith.mulf %15, %23 : vector<1x8xf32>
    %c0_10 = arith.constant 0 : index
    %c0_11 = arith.constant 0 : index
    %25 = vector.load %arg4[%c0_10, %c0_11] : memref<1x8xf32, #tpu.memory_space<vmem>>, vector<1x8xf32>
    tpu.vector_store %arg4[%c0_10, %c0_11], %24 {strides = array<i32>} : memref<1x8xf32, #tpu.memory_space<vmem>>, vector<1x8xf32>,
    return
  }
}

</mosaic_0001>

<bundles_post_ra>
// kernel: tpu_custom_call.1
= control target key start
LH: loop header
LB: loop body
LE: loop exit
PB: predicated region body
PF: predicated region fallthrough
CT: control target
= control target key end

     0   :  { %s166_s0 = inlined_call_operand.vmem [shape: f32[16,8], index: 0, kind: input, shape index: {}]   ;;  %s167_s1 = inlined_call_operand.vmem [shape: f32[16,1], index: 1, kind: input, shape index: {}]   ;;  %s168_s2 = inlined_call_operand.<no memory space> [shape: f32[1,1], index: 2, kind: input, shape index: {}]   ;;  %s169_s3 = inlined_call_operand.vmem [shape: f32[1,8], index: 3, kind: input, shape index: {}]   ;;  %s170_s4 = inlined_call_operand.hbm [shape: f32[1,8], index: 4, kind: output, shape index: {}]  }
   0x1   :  { %v21_v0 = vld [vmem:[%s167_s1] sm:$0xff] }
   0x2   :  { %10 = vsyncpa [#allocation4], 0  ;;  %v115_v1 = vmov 0   ;;  %v22_v2 = vld [vmem:[%s167_s1 + $0x8] sm:$0xff]  ;;  %v19_v4 = vld [vmem:[%s166_s0] sm:$0xff]  ;;  %vm35_vm0 = vcmask 64512   ;;  %v46_v17 = vstv %s168_s2 }
   0x3   :  { %84 = vset.pattern.permute.xlu0 %v115_v1  ;;  %v20_v5 = vld [vmem:[%s166_s0 + $0x8] sm:$0xff]  ;;  %v48_v19 = vld [vmem:[%s169_s3] sm:$0x1]  ;;  %vm50_vm1 = vcmask 57344   ;;  %s116_s0 = smov [#allocation3]   ;;  %s73_s27 = sshll.u32 %s170_s4, 4  ;;  %s74_s27 = int_to_ptr.hbm [resolvable:$true] %s73_s27 }
   0x4   :  { %25 = vperm.xlu0 %84, %v21_v0   ;;  %s71_s2 = sshll.u32 %s116_s0, 4  ;;  %s72_s2 = int_to_ptr.vmem [resolvable:$true] %s71_s2 }
   0xc   :  { %30 = vperm.xlu0 %84, %v22_v2  }
  0x76   :  { %v26_v3 = vpop.permute.xlu0 %25 }
  0x77   :  { %v33_v6 = vmul.f32 %v26_v3, %v19_v4 }
  0x79   :  { %v36_v9 = vsel %vm35_vm0, %v33_v6, 0.0 }
  0x7e   :  { %v31_v7 = vpop.permute.xlu0 %30 }
  0x7f   :  { %v34_v8 = vmul.f32 %v31_v7, %v20_v5 }
  0x81   :  { %v37_v10 = vsel %vm35_vm0, %v34_v8, 0.0 }
  0x82   :  { %v38_v11 = vadd.f32 %v37_v10, %v36_v9 }
  0x84   :  { %v39_v12 = vrot.slane %v38_v11, 4 }
  0x86   :  { %v40_v13 = vadd.f32 %v39_v12, %v38_v11 }
  0x88   :  { %v41_v14 = vrot.slane %v40_v13, 2 }
  0x8a   :  { %v42_v15 = vadd.f32 %v41_v14, %v40_v13 }
  0x8c   :  { %v43_v16 = vrot.slane %v42_v15, 1 }
  0x8e   :  { %v44_v18 = vadd.f32 %v43_v16, %v42_v15 }
  0x90   :  { %v47_v20 = vadd.f32 %v46_v17, %v44_v18 }
  0x92   :  { %v49_v21 = vadd.f32 %v48_v19, %v47_v20 }
  0x94   :  { %v51_v22 = vsel %vm50_vm1, %v49_v21, -inf }
  0x95   :  { %52 = vmax.xlane.f32.xlu1 %v51_v22 }
 0x108   :  { %v53_v23 = vpop.xlane.xlu1 %52 }
 0x109   :  { %v54_v24 = vsub.f32 %v49_v21, %v53_v23 }
 0x10b   :  { %v55_v25 = vmul.f32 1.442695, %v54_v24 }
 0x10d   :  { %85 = vpow2.f32 %v55_v25 }
 0x113   :  { %v86_v26 = vpop.eup %85 }
 0x114   :  { %v57_v27 = vsel %vm50_vm1, %v86_v26, 0.0 }
 0x115   :  { %58 = vadd.xlane.f32.xlu1 %v57_v27 }
 0x188   :  { %v59_v28 = vpop.xlane.xlu1 %58 }
 0x189   :  { %87 = vrcp.f32 %v59_v28 }
 0x18f   :  { %v88_v29 = vpop.eup %87 }
 0x190   :  { %v61_v30 = vmul.f32 %v88_v29, %v59_v28 }
 0x192   :  { %v62_v31 = vsub.f32 2.0, %v61_v30 }
 0x194   :  { %v63_v32 = vmul.f32 %v88_v29, %v62_v31 }
 0x196   :  { %v64_v33 = vmul.f32 %v86_v26, %v63_v32 }
 0x198   :  { %65 = vst.msk [vmem:[#allocation3] sm:$0x1] %vm50_vm1, %v64_v33 }
 0x199   :  { %76 = dma.vmem_to_hbm [thread:$0]  %s72_s2, 16, %s74_s27, [#allocation4]  }
 0x19a   :  { %113 = dma.done.wait [#allocation4], 16  }
 0x19b   :  { %114 = vsyncadd [#allocation4], 4294967280 }
 0x19c   :  { %81 = vsyncpa [#allocation4], 1 }

</bundles_post_ra>
